<compile_context>
chip_gen: v7x
topology: tpu7x:2x2x1
jax: 0.10.0
libtpu: 0.0.40
codegen_flags: <defaults>
</compile_context>

<pallas_src>
import functools
import math

import jax
import jax.numpy as jnp
from jax.experimental import pallas as pl
from jax.experimental.pallas import tpu as pltpu

BLOCK = 128          # fp8 block-quant granularity (module's `block_size`)
FP8_MAX = 448.0      # float8_e4m3fn max
LANE = 128           # TPU lane width


def _round_up(v, m):
    return ((v + m - 1) // m) * m


# -----------------------------------------------------------------------------
# fp8 block quantization helpers (wrapper-side; mirror the torch weight format)
# -----------------------------------------------------------------------------
def _quantize_blockwise(w_f32):
    """f32 (out, in) -> (fp8 (out, in), scale (ceil(out/128), ceil(in/128)) f32)."""
    out_f, in_f = w_f32.shape
    so, si = pl.cdiv(out_f, BLOCK), pl.cdiv(in_f, BLOCK)
    pad = jnp.zeros((so * BLOCK, si * BLOCK), jnp.float32).at[:out_f, :in_f].set(w_f32)
    blocks = pad.reshape(so, BLOCK, si, BLOCK)
    amax = jnp.max(jnp.abs(blocks), axis=(1, 3))
    scale = jnp.maximum(amax, 1e-6) / FP8_MAX
    s_full = jnp.repeat(jnp.repeat(scale, BLOCK, 0), BLOCK, 1)[:out_f, :in_f]
    w_fp8 = (w_f32 / s_full).astype(jnp.float8_e4m3fn)
    return w_fp8, scale


def _dequant(w_fp8, scale):
    """Mirror custom_weight_dequant: (out,in) fp8 * per-(128,128)-block scale."""
    out_f, in_f = w_fp8.shape
    s = jnp.repeat(jnp.repeat(scale, BLOCK, 0), BLOCK, 1)[:out_f, :in_f]
    return w_fp8.astype(jnp.float32) * s


# -----------------------------------------------------------------------------
# One-time parameter preparation (hoisted out of the forward pass)
# -----------------------------------------------------------------------------
def prepare_expert_params(raw, *, lora_scale, h_tile=None, dtype=jnp.bfloat16):
    """Transpose/pad the fp8 base weights + per-block scales into the kernel
    layout and pre-scale the LoRA up-projections by lora_scale.

    raw (torch layout):
      w{1,2,3}_q (out,in) fp8, w{1,2,3}_s (ceil(out/128), ceil(in/128)) f32,
      w{1,2,3}_down (rank, in) bf16, w{1,2,3}_up (out, rank) bf16.
    """
    H, D = raw["w1_q"].shape
    r = raw["w1_down"].shape[0]
    Dp, Hp, Rp = _round_up(D, LANE), _round_up(H, LANE), _round_up(r, LANE)

    if h_tile is None:
        # th must equal Hp or be a multiple of 1024 so the w2-scale block keeps
        # its second-to-last dim a multiple of 8 (TPU (8,128) block constraint).
        if Hp <= 2048:
            h_tile = Hp
        else:
            h_tile = next((c for c in (2048, 1024) if Hp % c == 0), Hp)

    def base(wq, ws, in_f, out_f, in_p, out_p):
        # fp8 weight: (out,in) -> transposed + zero-padded (in_p, out_p).
        wq_t = (jnp.zeros((in_p, out_p), jnp.float8_e4m3fn)
                .at[:in_f, :out_f].set(jnp.transpose(wq)))
        # per-(128,128)-block scale -> transposed, column-expanded:
        # (in_p // 128, out_p) f32.  Row-block compact keeps the in-kernel
        # broadcast a cheap sublane-group broadcast.
        ws_rows = jnp.repeat(jnp.transpose(ws), BLOCK, axis=1).astype(jnp.float32)
        return wq_t, ws_rows

    w1q, w1s = base(raw["w1_q"], raw["w1_s"], D, H, Dp, Hp)
    w3q, w3s = base(raw["w3_q"], raw["w3_s"], D, H, Dp, Hp)
    w2q, w2s = base(raw["w2_q"], raw["w2_s"], H, D, Hp, Dp)

    def lora(down, up, in_f, out_f, in_p, out_p):
        d = (jnp.zeros((in_p, Rp), dtype)
             .at[:in_f, :r].set(jnp.transpose(down).astype(dtype)))
        # Pre-scale the up-projection by lora_scale (exact; removes the
        # in-kernel broadcast multiply).
        u = (jnp.zeros((Rp, out_p), dtype)
             .at[:r, :out_f].set(
                 (jnp.transpose(up).astype(jnp.float32) * lora_scale).astype(dtype)))
        return d, u

    d1, u1 = lora(raw["w1_down"], raw["w1_up"], D, H, Dp, Hp)
    d3, u3 = lora(raw["w3_down"], raw["w3_up"], D, H, Dp, Hp)
    d2, u2 = lora(raw["w2_down"], raw["w2_up"], H, D, Hp, Dp)

    return dict(D=D, H=H, r=r, Dp=Dp, Hp=Hp, Rp=Rp, th=h_tile, dtype=dtype,
                w1q=w1q, w1s=w1s, w3q=w3q, w3s=w3s, w2q=w2q, w2s=w2s,
                d1=d1, u1=u1, d3=d3, u3=u3, d2=d2, u2=u2)


# -----------------------------------------------------------------------------
# Kernel
# -----------------------------------------------------------------------------
def _dequant_rows(wq, s_rows):
    """In-kernel fp8 block dequant.

    wq:     (K, N) fp8 tile.
    s_rows: (K // 128, N) f32 scale, already expanded along N (column axis).
    Returns bf16 (K, N).  The reshape only splits the sublane-major dim, so it
    is layout-friendly on TPU.
    """
    K, N = wq.shape
    w = wq.astype(jnp.float32).reshape(K // BLOCK, BLOCK, N)
    w = w * s_rows[:, None, :]
    return w.reshape(K, N).astype(jnp.bfloat16)


def _expert_kernel(x_ref, w1q_ref, w1s_ref, w3q_ref, w3s_ref, w2q_ref, w2s_ref,
                   d1_ref, u1_ref, d3_ref, u3_ref, d2_ref, u2_ref,
                   o_ref,
                   acc_ref, t2_ref, t1_ref, t3_ref, *, use_lora):
    """Grid = (token tiles, H tiles).  One (tm, th) step of the SwiGLU MLP with
    LoRA, f32 accumulation across H tiles."""
    hi = pl.program_id(1)
    nh = pl.num_programs(1)
    x = x_ref[...]                                            # bf16 (tm, Dp)

    @pl.when(hi == 0)
    def _init():
        acc_ref[...] = jnp.zeros_like(acc_ref)
        if use_lora:
            t2_ref[...] = jnp.zeros_like(t2_ref)
            # LoRA down-projections depend only on x -> compute once per token
            # tile, reuse across the H-streaming loop.
            t1_ref[...] = jnp.dot(x, d1_ref[...],
                                  preferred_element_type=jnp.float32).astype(t1_ref.dtype)
            t3_ref[...] = jnp.dot(x, d3_ref[...],
                                  preferred_element_type=jnp.float32).astype(t3_ref.dtype)

    # --- up/gate projections for this H slice (fp8 dequantized in-kernel) ----
    w1 = _dequant_rows(w1q_ref[...], w1s_ref[...])            # bf16 (Dp, th)
    w3 = _dequant_rows(w3q_ref[...], w3s_ref[...])            # bf16 (Dp, th)
    a1 = jnp.dot(x, w1, preferred_element_type=jnp.float32)   # w1(x) -> SiLU branch
    a3 = jnp.dot(x, w3, preferred_element_type=jnp.float32)   # w3(x) -> linear branch
    if use_lora:
        a1 = a1 + jnp.dot(t1_ref[...], u1_ref[...],
                          preferred_element_type=jnp.float32)   # u pre-scaled
        a3 = a3 + jnp.dot(t3_ref[...], u3_ref[...],
                          preferred_element_type=jnp.float32)
    g = (a1 * jax.nn.sigmoid(a1) * a3).astype(x.dtype)        # SiLU(w1 x) * w3 x

    # --- down projection: accumulate this H slice into the f32 scratch -------
    w2 = _dequant_rows(w2q_ref[...], w2s_ref[...])            # bf16 (th, Dp)
    acc_ref[...] += jnp.dot(g, w2, preferred_element_type=jnp.float32)
    if use_lora:
        t2_ref[...] += jnp.dot(g, d2_ref[...], preferred_element_type=jnp.float32)

    @pl.when(hi == nh - 1)
    def _finish():
        y = acc_ref[...]
        if use_lora:
            y = y + jnp.dot(t2_ref[...].astype(x.dtype), u2_ref[...],
                            preferred_element_type=jnp.float32)
        o_ref[...] = y.astype(o_ref.dtype)


# -----------------------------------------------------------------------------
# Wrapper
# -----------------------------------------------------------------------------
def expert_forward(x_tokens, prep, *, use_lora=True, tm_max=256):
    """x_tokens: (N, D) bf16.  prep: output of prepare_expert_params."""
    N, D = x_tokens.shape
    assert D == prep["D"]
    Dp, Hp, Rp, th = prep["Dp"], prep["Hp"], prep["Rp"], prep["th"]
    dt = prep["dtype"]

    # Decode-aware token tile (bf16 sublane multiple), capped for prefill.
    tm = min(tm_max, max(16, _round_up(N, 16)))
    Np = _round_up(N, tm)
    gh = Hp // th

    xp = jnp.zeros((Np, Dp), dt).at[:N, :D].set(x_tokens.astype(dt))

    def nbytes(shape, dtype):
        return int(math.prod(shape)) * jnp.dtype(dtype).itemsize

    # Streamed weight blocks are double-buffered by the Pallas pipeline.
    need = (
        4 * nbytes((tm, Dp), dt)                                            # x + out
        + 4 * (nbytes((Dp, th), jnp.float8_e4m3fn)
               + nbytes((Dp // BLOCK, th), jnp.float32))                    # w1 + w3
        + 2 * (nbytes((th, Dp), jnp.float8_e4m3fn)
               + nbytes((th // BLOCK, Dp), jnp.float32))                    # w2
        + 2 * (2 * nbytes((Dp, Rp), dt) + 2 * nbytes((Rp, th), dt)
               + nbytes((th, Rp), dt) + nbytes((Rp, Dp), dt))               # LoRA
        + nbytes((tm, Dp), jnp.float32) + nbytes((tm, Rp), jnp.float32)
        + 2 * nbytes((tm, Rp), dt)                                          # scratch
    )
    try:
        cap = int(getattr(pltpu.get_tpu_info(), "vmem_capacity_bytes", 128 << 20))
    except Exception:
        cap = 64 << 20
    vmem_limit = int(min(max(need + (4 << 20), 32 << 20), cap - (8 << 20)))

    flops = 2 * Np * (2 * Dp * Hp + Hp * Dp)
    if use_lora:
        flops += 2 * Np * (2 * Dp * Rp + 2 * Rp * Hp + Hp * Rp + Rp * Dp)
    bytes_accessed = int(
        prep["w1q"].size + prep["w3q"].size + prep["w2q"].size
        + 4 * (prep["w1s"].size + prep["w3s"].size + prep["w2s"].size)
        + 2 * (prep["d1"].size + prep["u1"].size + prep["d3"].size
               + prep["u3"].size + prep["d2"].size + prep["u2"].size)
        + 2 * (xp.size + Np * Dp))

    kernel = functools.partial(_expert_kernel, use_lora=use_lora)

    out = pl.pallas_call(
        kernel,
        out_shape=jax.ShapeDtypeStruct((Np, Dp), dt),
        grid_spec=pltpu.PrefetchScalarGridSpec(
            num_scalar_prefetch=0,
            grid=(Np // tm, gh),
            in_specs=[
                pl.BlockSpec((tm, Dp), lambda i, h: (i, 0)),            # x tile
                pl.BlockSpec((Dp, th), lambda i, h: (0, h)),            # w1 fp8
                pl.BlockSpec((Dp // BLOCK, th), lambda i, h: (0, h)),   # w1 scale
                pl.BlockSpec((Dp, th), lambda i, h: (0, h)),            # w3 fp8
                pl.BlockSpec((Dp // BLOCK, th), lambda i, h: (0, h)),   # w3 scale
                pl.BlockSpec((th, Dp), lambda i, h: (h, 0)),            # w2 fp8
                pl.BlockSpec((th // BLOCK, Dp), lambda i, h: (h, 0)),   # w2 scale
                pl.BlockSpec((Dp, Rp), lambda i, h: (0, 0)),            # lora d1
                pl.BlockSpec((Rp, th), lambda i, h: (0, h)),            # lora u1*s
                pl.BlockSpec((Dp, Rp), lambda i, h: (0, 0)),            # lora d3
                pl.BlockSpec((Rp, th), lambda i, h: (0, h)),            # lora u3*s
                pl.BlockSpec((th, Rp), lambda i, h: (h, 0)),            # lora d2
                pl.BlockSpec((Rp, Dp), lambda i, h: (0, 0)),            # lora u2*s
            ],
            out_specs=pl.BlockSpec((tm, Dp), lambda i, h: (i, 0)),
            scratch_shapes=[
                pltpu.VMEM((tm, Dp), jnp.float32),   # down-proj accumulator
                pltpu.VMEM((tm, Rp), jnp.float32),   # LoRA-w2 down accumulator
                pltpu.VMEM((tm, Rp), dt),            # x @ d1
                pltpu.VMEM((tm, Rp), dt),            # x @ d3
            ],
        ),
        compiler_params=pltpu.CompilerParams(
            dimension_semantics=("parallel", "arbitrary"),
            vmem_limit_bytes=vmem_limit),
        cost_estimate=pl.CostEstimate(
            flops=int(flops), transcendentals=int(Np * Hp),
            bytes_accessed=bytes_accessed),
    )(xp, prep["w1q"], prep["w1s"], prep["w3q"], prep["w3s"],
      prep["w2q"], prep["w2s"],
      prep["d1"], prep["u1"], prep["d3"], prep["u3"], prep["d2"], prep["u2"])
    return out[:N, :D]


# -----------------------------------------------------------------------------
# Pure-JAX reference (mirrors the torch module's eval forward)
# -----------------------------------------------------------------------------
def _reference(x_tokens, raw, lora_scale, use_lora=True):
    x = x_tokens.astype(jnp.float32)

    def lin(inp, wq, ws, down, up):
        w = jnp.transpose(_dequant(wq, ws)).astype(jnp.bfloat16).astype(jnp.float32)
        y = inp @ w
        if use_lora:
            d = jnp.transpose(down).astype(jnp.float32)
            u = jnp.transpose(up).astype(jnp.float32)
            y = y + lora_scale * ((inp @ d) @ u)
        return y

    a1 = lin(x, raw["w1_q"], raw["w1_s"], raw["w1_down"], raw["w1_up"])
    a3 = lin(x, raw["w3_q"], raw["w3_s"], raw["w3_down"], raw["w3_up"])
    g = a1 * jax.nn.sigmoid(a1) * a3
    return lin(g, raw["w2_q"], raw["w2_s"], raw["w2_down"], raw["w2_up"])


if __name__ == "__main__":
    # Small shapes consistent with the module: dim=32, inter_dim=64,
    # LoRA rank=8, alpha=16; x is (batch=2, seq=8, dim=32).
    dim, inter_dim, rank, alpha = 32, 64, 8, 16
    batch, seq = 2, 8
    lora_scale = alpha / rank

    key = jax.random.PRNGKey(0)
    kx, k1, k2, k3, kd1, kd2, kd3, ku1, ku2, ku3 = jax.random.split(key, 10)

    x = (jax.random.normal(kx, (batch, seq, dim), jnp.float32) * 0.5).astype(jnp.bfloat16)

    def make_base(k, out_f, in_f):
        w = jax.random.normal(k, (out_f, in_f), jnp.float32) * 0.05
        return _quantize_blockwise(w)                      # fp8 (out,in) + block scale

    def kaiming_uniform(k, out_f, in_f):
        bound = 1.0 / math.sqrt(in_f)
        return jax.random.uniform(k, (out_f, in_f), jnp.float32, -bound, bound)

    w1_q, w1_s = make_base(k1, inter_dim, dim)
    w2_q, w2_s = make_base(k2, dim, inter_dim)
    w3_q, w3_s = make_base(k3, inter_dim, dim)

    # The module inits lora_up to zeros; small nonzero values are used here so
    # the LoRA path is actually exercised numerically.
    raw = {
        "w1_q": w1_q, "w1_s": w1_s,
        "w2_q": w2_q, "w2_s": w2_s,
        "w3_q": w3_q, "w3_s": w3_s,
        "w1_down": kaiming_uniform(kd1, rank, dim).astype(jnp.bfloat16),
        "w1_up": (jax.random.normal(ku1, (inter_dim, rank), jnp.float32) * 0.05).astype(jnp.bfloat16),
        "w3_down": kaiming_uniform(kd3, rank, dim).astype(jnp.bfloat16),
        "w3_up": (jax.random.normal(ku3, (inter_dim, rank), jnp.float32) * 0.05).astype(jnp.bfloat16),
        "w2_down": kaiming_uniform(kd2, rank, inter_dim).astype(jnp.bfloat16),
        "w2_up": (jax.random.normal(ku2, (dim, rank), jnp.float32) * 0.05).astype(jnp.bfloat16),
    }

    prep = prepare_expert_params(raw, lora_scale=lora_scale)   # one-time setup
    x_tokens = x.reshape(batch * seq, dim)                     # (N, D) token-major

    out = expert_forward(x_tokens, prep, use_lora=True)
    out = jax.block_until_ready(out)

    ref = _reference(x_tokens, raw, lora_scale, use_lora=True)
    err = float(jnp.max(jnp.abs(out.astype(jnp.float32) - ref)))
    assert out.shape == (batch * seq, dim) and out.dtype == jnp.bfloat16
    assert err < 5e-2, f"max abs error {err}"

    out_bsd = out.reshape(batch, seq, dim)                     # back to (B, S, D)
    jax.block_until_ready(out_bsd)
    print("KERNEL_OK")
</pallas_src>

<mosaic_0001>
module attributes {stable_mosaic.version = 11 : i64} {
  func.func @_expert_kernel(%arg0: i32, %arg1: i32, %arg2: memref<16x128xbf16, #tpu.memory_space<vmem>>, %arg3: memref<128x128xf8E4M3FN, #tpu.memory_space<vmem>>, %arg4: memref<1x128xf32, #tpu.memory_space<vmem>>, %arg5: memref<128x128xf8E4M3FN, #tpu.memory_space<vmem>>, %arg6: memref<1x128xf32, #tpu.memory_space<vmem>>, %arg7: memref<128x128xf8E4M3FN, #tpu.memory_space<vmem>>, %arg8: memref<1x128xf32, #tpu.memory_space<vmem>>, %arg9: memref<128x128xbf16, #tpu.memory_space<vmem>>, %arg10: memref<128x128xbf16, #tpu.memory_space<vmem>>, %arg11: memref<128x128xbf16, #tpu.memory_space<vmem>>, %arg12: memref<128x128xbf16, #tpu.memory_space<vmem>>, %arg13: memref<128x128xbf16, #tpu.memory_space<vmem>>, %arg14: memref<128x128xbf16, #tpu.memory_space<vmem>>, %arg15: memref<16x128xbf16, #tpu.memory_space<vmem>>, %arg16: memref<16x128xf32, #tpu.memory_space<vmem>>, %arg17: memref<16x128xf32, #tpu.memory_space<vmem>>, %arg18: memref<16x128xbf16, #tpu.memory_space<vmem>>, %arg19: memref<16x128xbf16, #tpu.memory_space<vmem>>) attributes {dimension_semantics = [#tpu.dimension_semantics<parallel>, #tpu.dimension_semantics<arbitrary>], iteration_bounds = array<i64: 1, 1>, scalar_prefetch = 0 : i64, scratch_operands = 4 : i64, tpu.core_type = #tpu.core_type<tc>, window_params = [{transform_indices = @transform_0, window_bounds = array<i64: 16, 128>}, {transform_indices = @transform_1, window_bounds = array<i64: 128, 128>}, {transform_indices = @transform_2, window_bounds = array<i64: 1, 128>}, {transform_indices = @transform_3, window_bounds = array<i64: 128, 128>}, {transform_indices = @transform_4, window_bounds = array<i64: 1, 128>}, {transform_indices = @transform_5, window_bounds = array<i64: 128, 128>}, {transform_indices = @transform_6, window_bounds = array<i64: 1, 128>}, {pipeline_mode = #tpu.pipeline_mode<synchronous>, transform_indices = @transform_7, window_bounds = array<i64: 128, 128>}, {transform_indices = @transform_8, window_bounds = array<i64: 128, 128>}, {pipeline_mode = #tpu.pipeline_mode<synchronous>, transform_indices = @transform_9, window_bounds = array<i64: 128, 128>}, {transform_indices = @transform_10, window_bounds = array<i64: 128, 128>}, {transform_indices = @transform_11, window_bounds = array<i64: 128, 128>}, {pipeline_mode = #tpu.pipeline_mode<synchronous>, transform_indices = @transform_12, window_bounds = array<i64: 128, 128>}, {transform_indices = @transform_13, window_bounds = array<i64: 16, 128>}]} {
    %c0 = arith.constant 0 : index
    %c0_0 = arith.constant 0 : index
    %0 = vector.load %arg2[%c0, %c0_0] : memref<16x128xbf16, #tpu.memory_space<vmem>>, vector<16x128xbf16>
    %c0_i32 = arith.constant 0 : i32
    %1 = arith.cmpi eq, %arg1, %c0_i32 : i32
    %2 = arith.extui %1 : i1 to i32
    %c0_i32_1 = arith.constant 0 : i32
    %3 = arith.cmpi ne, %2, %c0_i32_1 : i32
    scf.if %3 {
      %cst_40 = arith.constant 0.000000e+00 : f32
      %61 = vector.broadcast %cst_40 : f32 to vector<16x128xf32>
      %c0_41 = arith.constant 0 : index
      %c0_42 = arith.constant 0 : index
      %62 = vector.load %arg16[%c0_41, %c0_42] : memref<16x128xf32, #tpu.memory_space<vmem>>, vector<16x128xf32>
      tpu.vector_store %arg16[%c0_41, %c0_42], %61 {strides = array<i32>} : memref<16x128xf32, #tpu.memory_space<vmem>>, vector<16x128xf32>,
      %cst_43 = arith.constant 0.000000e+00 : f32
      %63 = vector.broadcast %cst_43 : f32 to vector<16x128xf32>
      %c0_44 = arith.constant 0 : index
      %c0_45 = arith.constant 0 : index
      %64 = vector.load %arg17[%c0_44, %c0_45] : memref<16x128xf32, #tpu.memory_space<vmem>>, vector<16x128xf32>
      tpu.vector_store %arg17[%c0_44, %c0_45], %63 {strides = array<i32>} : memref<16x128xf32, #tpu.memory_space<vmem>>, vector<16x128xf32>,
      %c0_46 = arith.constant 0 : index
      %c0_47 = arith.constant 0 : index
      %65 = vector.load %arg9[%c0_46, %c0_47] : memref<128x128xbf16, #tpu.memory_space<vmem>>, vector<128x128xbf16>
      %cst_48 = arith.constant dense<0.000000e+00> : vector<16x128xf32>
      %66 = tpu.matmul %0, %65, %cst_48 {dimension_numbers = #tpu.dot_dimension_numbers<[1], [0], [0], [1], [0, 0, 1, 1], [], []>} : vector<16x128xbf16>, vector<128x128xbf16>, vector<16x128xf32> -> vector<16x128xf32>
      %67 = arith.truncf %66 : vector<16x128xf32> to vector<16x128xbf16>
      %c0_49 = arith.constant 0 : index
      %c0_50 = arith.constant 0 : index
      %68 = vector.load %arg18[%c0_49, %c0_50] : memref<16x128xbf16, #tpu.memory_space<vmem>>, vector<16x128xbf16>
      tpu.vector_store %arg18[%c0_49, %c0_50], %67 {strides = array<i32>} : memref<16x128xbf16, #tpu.memory_space<vmem>>, vector<16x128xbf16>,
      %c0_51 = arith.constant 0 : index
      %c0_52 = arith.constant 0 : index
      %69 = vector.load %arg11[%c0_51, %c0_52] : memref<128x128xbf16, #tpu.memory_space<vmem>>, vector<128x128xbf16>
      %cst_53 = arith.constant dense<0.000000e+00> : vector<16x128xf32>
      %70 = tpu.matmul %0, %69, %cst_53 {dimension_numbers = #tpu.dot_dimension_numbers<[1], [0], [0], [1], [0, 0, 1, 1], [], []>} : vector<16x128xbf16>, vector<128x128xbf16>, vector<16x128xf32> -> vector<16x128xf32>
      %71 = arith.truncf %70 : vector<16x128xf32> to vector<16x128xbf16>
      %c0_54 = arith.constant 0 : index
      %c0_55 = arith.constant 0 : index
      %72 = vector.load %arg19[%c0_54, %c0_55] : memref<16x128xbf16, #tpu.memory_space<vmem>>, vector<16x128xbf16>
      tpu.vector_store %arg19[%c0_54, %c0_55], %71 {strides = array<i32>} : memref<16x128xbf16, #tpu.memory_space<vmem>>, vector<16x128xbf16>,
    } else {
    }
    %c0_2 = arith.constant 0 : index
    %c0_3 = arith.constant 0 : index
    %4 = vector.load %arg3[%c0_2, %c0_3] : memref<128x128xf8E4M3FN, #tpu.memory_space<vmem>>, vector<128x128xf8E4M3FN>
    %c0_4 = arith.constant 0 : index
    %c0_5 = arith.constant 0 : index
    %5 = vector.load %arg4[%c0_4, %c0_5] : memref<1x128xf32, #tpu.memory_space<vmem>>, vector<1x128xf32>
    %6 = arith.extf %4 : vector<128x128xf8E4M3FN> to vector<128x128xf32>
    %7 = vector.shape_cast %6 : vector<128x128xf32> to vector<1x128x128xf32>
    %8 = vector.shape_cast %5 : vector<1x128xf32> to vector<1x1x128xf32>
    %9 = vector.broadcast %8 : vector<1x1x128xf32> to vector<1x128x128xf32>
    %10 = arith.mulf %7, %9 : vector<1x128x128xf32>
    %11 = vector.shape_cast %10 : vector<1x128x128xf32> to vector<128x128xf32>
    %12 = arith.truncf %11 : vector<128x128xf32> to vector<128x128xbf16>
    %c0_6 = arith.constant 0 : index
    %c0_7 = arith.constant 0 : index
    %13 = vector.load %arg5[%c0_6, %c0_7] : memref<128x128xf8E4M3FN, #tpu.memory_space<vmem>>, vector<128x128xf8E4M3FN>
    %c0_8 = arith.constant 0 : index
    %c0_9 = arith.constant 0 : index
    %14 = vector.load %arg6[%c0_8, %c0_9] : memref<1x128xf32, #tpu.memory_space<vmem>>, vector<1x128xf32>
    %15 = arith.extf %13 : vector<128x128xf8E4M3FN> to vector<128x128xf32>
    %16 = vector.shape_cast %15 : vector<128x128xf32> to vector<1x128x128xf32>
    %17 = vector.shape_cast %14 : vector<1x128xf32> to vector<1x1x128xf32>
    %18 = vector.broadcast %17 : vector<1x1x128xf32> to vector<1x128x128xf32>
    %19 = arith.mulf %16, %18 : vector<1x128x128xf32>
    %20 = vector.shape_cast %19 : vector<1x128x128xf32> to vector<128x128xf32>
    %21 = arith.truncf %20 : vector<128x128xf32> to vector<128x128xbf16>
    %cst = arith.constant dense<0.000000e+00> : vector<16x128xf32>
    %22 = tpu.matmul %0, %12, %cst {dimension_numbers = #tpu.dot_dimension_numbers<[1], [0], [0], [1], [0, 0, 1, 1], [], []>} : vector<16x128xbf16>, vector<128x128xbf16>, vector<16x128xf32> -> vector<16x128xf32>
    %cst_10 = arith.constant dense<0.000000e+00> : vector<16x128xf32>
    %23 = tpu.matmul %0, %21, %cst_10 {dimension_numbers = #tpu.dot_dimension_numbers<[1], [0], [0], [1], [0, 0, 1, 1], [], []>} : vector<16x128xbf16>, vector<128x128xbf16>, vector<16x128xf32> -> vector<16x128xf32>
    %c0_11 = arith.constant 0 : index
    %c0_12 = arith.constant 0 : index
    %24 = vector.load %arg18[%c0_11, %c0_12] : memref<16x128xbf16, #tpu.memory_space<vmem>>, vector<16x128xbf16>
    %c0_13 = arith.constant 0 : index
    %c0_14 = arith.constant 0 : index
    %25 = vector.load %arg10[%c0_13, %c0_14] : memref<128x128xbf16, #tpu.memory_space<vmem>>, vector<128x128xbf16>
    %cst_15 = arith.constant dense<0.000000e+00> : vector<16x128xf32>
    %26 = tpu.matmul %24, %25, %cst_15 {dimension_numbers = #tpu.dot_dimension_numbers<[1], [0], [0], [1], [0, 0, 1, 1], [], []>} : vector<16x128xbf16>, vector<128x128xbf16>, vector<16x128xf32> -> vector<16x128xf32>
    %27 = arith.addf %22, %26 : vector<16x128xf32>
    %c0_16 = arith.constant 0 : index
    %c0_17 = arith.constant 0 : index
    %28 = vector.load %arg19[%c0_16, %c0_17] : memref<16x128xbf16, #tpu.memory_space<vmem>>, vector<16x128xbf16>
    %c0_18 = arith.constant 0 : index
    %c0_19 = arith.constant 0 : index
    %29 = vector.load %arg12[%c0_18, %c0_19] : memref<128x128xbf16, #tpu.memory_space<vmem>>, vector<128x128xbf16>
    %cst_20 = arith.constant dense<0.000000e+00> : vector<16x128xf32>
    %30 = tpu.matmul %28, %29, %cst_20 {dimension_numbers = #tpu.dot_dimension_numbers<[1], [0], [0], [1], [0, 0, 1, 1], [], []>} : vector<16x128xbf16>, vector<128x128xbf16>, vector<16x128xf32> -> vector<16x128xf32>
    %31 = arith.addf %23, %30 : vector<16x128xf32>
    %32 = arith.negf %27 : vector<16x128xf32>
    %33 = math.exp %32 : vector<16x128xf32>
    %cst_21 = arith.constant 1.000000e+00 : f32
    %34 = vector.broadcast %cst_21 : f32 to vector<16x128xf32>
    %35 = arith.addf %34, %33 : vector<16x128xf32>
    %36 = arith.divf %34, %35 : vector<16x128xf32>
    %37 = arith.mulf %27, %36 : vector<16x128xf32>
    %38 = arith.mulf %37, %31 : vector<16x128xf32>
    %39 = arith.truncf %38 : vector<16x128xf32> to vector<16x128xbf16>
    %c0_22 = arith.constant 0 : index
    %c0_23 = arith.constant 0 : index
    %40 = vector.load %arg7[%c0_22, %c0_23] : memref<128x128xf8E4M3FN, #tpu.memory_space<vmem>>, vector<128x128xf8E4M3FN>
    %c0_24 = arith.constant 0 : index
    %c0_25 = arith.constant 0 : index
    %41 = vector.load %arg8[%c0_24, %c0_25] : memref<1x128xf32, #tpu.memory_space<vmem>>, vector<1x128xf32>
    %42 = arith.extf %40 : vector<128x128xf8E4M3FN> to vector<128x128xf32>
    %43 = vector.shape_cast %42 : vector<128x128xf32> to vector<1x128x128xf32>
    %44 = vector.shape_cast %41 : vector<1x128xf32> to vector<1x1x128xf32>
    %45 = vector.broadcast %44 : vector<1x1x128xf32> to vector<1x128x128xf32>
    %46 = arith.mulf %43, %45 : vector<1x128x128xf32>
    %47 = vector.shape_cast %46 : vector<1x128x128xf32> to vector<128x128xf32>
    %48 = arith.truncf %47 : vector<128x128xf32> to vector<128x128xbf16>
    %c0_26 = arith.constant 0 : index
    %c0_27 = arith.constant 0 : index
    %49 = vector.load %arg16[%c0_26, %c0_27] : memref<16x128xf32, #tpu.memory_space<vmem>>, vector<16x128xf32>
    %cst_28 = arith.constant dense<0.000000e+00> : vector<16x128xf32>
    %50 = tpu.matmul %39, %48, %cst_28 {dimension_numbers = #tpu.dot_dimension_numbers<[1], [0], [0], [1], [0, 0, 1, 1], [], []>} : vector<16x128xbf16>, vector<128x128xbf16>, vector<16x128xf32> -> vector<16x128xf32>
    %51 = arith.addf %49, %50 : vector<16x128xf32>
    %c0_29 = arith.constant 0 : index
    %c0_30 = arith.constant 0 : index
    %52 = vector.load %arg16[%c0_29, %c0_30] : memref<16x128xf32, #tpu.memory_space<vmem>>, vector<16x128xf32>
    tpu.vector_store %arg16[%c0_29, %c0_30], %51 {strides = array<i32>} : memref<16x128xf32, #tpu.memory_space<vmem>>, vector<16x128xf32>,
    %c0_31 = arith.constant 0 : index
    %c0_32 = arith.constant 0 : index
    %53 = vector.load %arg17[%c0_31, %c0_32] : memref<16x128xf32, #tpu.memory_space<vmem>>, vector<16x128xf32>
    %c0_33 = arith.constant 0 : index
    %c0_34 = arith.constant 0 : index
    %54 = vector.load %arg13[%c0_33, %c0_34] : memref<128x128xbf16, #tpu.memory_space<vmem>>, vector<128x128xbf16>
    %cst_35 = arith.constant dense<0.000000e+00> : vector<16x128xf32>
    %55 = tpu.matmul %39, %54, %cst_35 {dimension_numbers = #tpu.dot_dimension_numbers<[1], [0], [0], [1], [0, 0, 1, 1], [], []>} : vector<16x128xbf16>, vector<128x128xbf16>, vector<16x128xf32> -> vector<16x128xf32>
    %56 = arith.addf %53, %55 : vector<16x128xf32>
    %c0_36 = arith.constant 0 : index
    %c0_37 = arith.constant 0 : index
    %57 = vector.load %arg17[%c0_36, %c0_37] : memref<16x128xf32, #tpu.memory_space<vmem>>, vector<16x128xf32>
    tpu.vector_store %arg17[%c0_36, %c0_37], %56 {strides = array<i32>} : memref<16x128xf32, #tpu.memory_space<vmem>>, vector<16x128xf32>,
    %c0_i32_38 = arith.constant 0 : i32
    %58 = arith.cmpi eq, %arg1, %c0_i32_38 : i32
    %59 = arith.extui %58 : i1 to i32
    %c0_i32_39 = arith.constant 0 : i32
    %60 = arith.cmpi ne, %59, %c0_i32_39 : i32
    scf.if %60 {
      %c0_40 = arith.constant 0 : index
      %c0_41 = arith.constant 0 : index
      %61 = vector.load %arg16[%c0_40, %c0_41] : memref<16x128xf32, #tpu.memory_space<vmem>>, vector<16x128xf32>
      %c0_42 = arith.constant 0 : index
      %c0_43 = arith.constant 0 : index
      %62 = vector.load %arg17[%c0_42, %c0_43] : memref<16x128xf32, #tpu.memory_space<vmem>>, vector<16x128xf32>
      %63 = arith.truncf %62 : vector<16x128xf32> to vector<16x128xbf16>
      %c0_44 = arith.constant 0 : index
      %c0_45 = arith.constant 0 : index
      %64 = vector.load %arg14[%c0_44, %c0_45] : memref<128x128xbf16, #tpu.memory_space<vmem>>, vector<128x128xbf16>
      %cst_46 = arith.constant dense<0.000000e+00> : vector<16x128xf32>
      %65 = tpu.matmul %63, %64, %cst_46 {dimension_numbers = #tpu.dot_dimension_numbers<[1], [0], [0], [1], [0, 0, 1, 1], [], []>} : vector<16x128xbf16>, vector<128x128xbf16>, vector<16x128xf32> -> vector<16x128xf32>
      %66 = arith.addf %61, %65 : vector<16x128xf32>
      %67 = arith.truncf %66 : vector<16x128xf32> to vector<16x128xbf16>
      %c0_47 = arith.constant 0 : index
      %c0_48 = arith.constant 0 : index
      %68 = vector.load %arg15[%c0_47, %c0_48] : memref<16x128xbf16, #tpu.memory_space<vmem>>, vector<16x128xbf16>
      tpu.vector_store %arg15[%c0_47, %c0_48], %67 {strides = array<i32>} : memref<16x128xbf16, #tpu.memory_space<vmem>>, vector<16x128xbf16>,
    } else {
    }
    return
  }
  func.func @transform_0(%arg0: i32, %arg1: i32) -> (i32, i32) {
    %c0_i32 = arith.constant 0 : i32
    %c0_i32_0 = arith.constant 0 : i32
    return %arg0, %c0_i32 : i32, i32
  }
  func.func @transform_1(%arg0: i32, %arg1: i32) -> (i32, i32) {
    %c0_i32 = arith.constant 0 : i32
    %c0_i32_0 = arith.constant 0 : i32
    return %c0_i32, %arg1 : i32, i32
  }
  func.func @transform_2(%arg0: i32, %arg1: i32) -> (i32, i32) {
    %c0_i32 = arith.constant 0 : i32
    %c0_i32_0 = arith.constant 0 : i32
    return %c0_i32, %arg1 : i32, i32
  }
  func.func @transform_3(%arg0: i32, %arg1: i32) -> (i32, i32) {
    %c0_i32 = arith.constant 0 : i32
    %c0_i32_0 = arith.constant 0 : i32
    return %c0_i32, %arg1 : i32, i32
  }
  func.func @transform_4(%arg0: i32, %arg1: i32) -> (i32, i32) {
    %c0_i32 = arith.constant 0 : i32
    %c0_i32_0 = arith.constant 0 : i32
    return %c0_i32, %arg1 : i32, i32
  }
  func.func @transform_5(%arg0: i32, %arg1: i32) -> (i32, i32) {
    %c0_i32 = arith.constant 0 : i32
    %c0_i32_0 = arith.constant 0 : i32
    return %arg1, %c0_i32 : i32, i32
  }
  func.func @transform_6(%arg0: i32, %arg1: i32) -> (i32, i32) {
    %c0_i32 = arith.constant 0 : i32
    %c0_i32_0 = arith.constant 0 : i32
    return %arg1, %c0_i32 : i32, i32
  }
  func.func @transform_7(%arg0: i32, %arg1: i32) -> (i32, i32) {
    %c0_i32 = arith.constant 0 : i32
    %c0_i32_0 = arith.constant 0 : i32
    %c0_i32_1 = arith.constant 0 : i32
    return %c0_i32, %c0_i32_0 : i32, i32
  }
  func.func @transform_8(%arg0: i32, %arg1: i32) -> (i32, i32) {
    %c0_i32 = arith.constant 0 : i32
    %c0_i32_0 = arith.constant 0 : i32
    return %c0_i32, %arg1 : i32, i32
  }
  func.func @transform_9(%arg0: i32, %arg1: i32) -> (i32, i32) {
    %c0_i32 = arith.constant 0 : i32
    %c0_i32_0 = arith.constant 0 : i32
    %c0_i32_1 = arith.constant 0 : i32
    return %c0_i32, %c0_i32_0 : i32, i32
  }
  func.func @transform_10(%arg0: i32, %arg1: i32) -> (i32, i32) {
    %c0_i32 = arith.constant 0 : i32
    %c0_i32_0 = arith.constant 0 : i32
    return %c0_i32, %arg1 : i32, i32
  }
  func.func @transform_11(%arg0: i32, %arg1: i32) -> (i32, i32) {
    %c0_i32 = arith.constant 0 : i32
    %c0_i32_0 = arith.constant 0 : i32
    return %arg1, %c0_i32 : i32, i32
  }
  func.func @transform_12(%arg0: i32, %arg1: i32) -> (i32, i32) {
    %c0_i32 = arith.constant 0 : i32
    %c0_i32_0 = arith.constant 0 : i32
    %c0_i32_1 = arith.constant 0 : i32
    return %c0_i32, %c0_i32_0 : i32, i32
  }
  func.func @transform_13(%arg0: i32, %arg1: i32) -> (i32, i32) {
    %c0_i32 = arith.constant 0 : i32
    %c0_i32_0 = arith.constant 0 : i32
    return %arg0, %c0_i32 : i32, i32
  }
}

</mosaic_0001>

<bundles_post_ra>
// kernel: tpu_custom_call.1
= control target key start
LH: loop header
LB: loop body
LE: loop exit
PB: predicated region body
PF: predicated region fallthrough
CT: control target
= control target key end

     0   :  { %18 = vsyncpa [#allocation7], 0  ;;  %s2293_s0 = inlined_call_operand.hbm [shape: bf16[16,128], index: 0, kind: input, shape index: {}]   ;;  %s2294_s1 = inlined_call_operand.hbm [shape: f8e4m3fn[128,128], index: 1, kind: input, shape index: {}]   ;;  %s2295_s2 = inlined_call_operand.vmem [shape: f32[1,128], index: 2, kind: input, shape index: {}]   ;;  %s2296_s3 = inlined_call_operand.hbm [shape: f8e4m3fn[128,128], index: 3, kind: input, shape index: {}]   ;;  %s2297_s4 = inlined_call_operand.vmem [shape: f32[1,128], index: 4, kind: input, shape index: {}]   ;;  %s2298_s5 = inlined_call_operand.hbm [shape: f8e4m3fn[128,128], index: 5, kind: input, shape index: {}]   ;;  %s2299_s6 = inlined_call_operand.vmem [shape: f32[1,128], index: 6, kind: input, shape index: {}]   ;;  %s2300_s7 = inlined_call_operand.hbm [shape: bf16[128,128], index: 7, kind: input, shape index: {}]   ;;  %s2301_s8 = inlined_call_operand.hbm [shape: bf16[128,128], index: 8, kind: input, shape index: {}]   ;;  %s2302_s9 = inlined_call_operand.hbm [shape: bf16[128,128], index: 9, kind: input, shape index: {}]   ;;  %s2303_s10 = inlined_call_operand.hbm [shape: bf16[128,128], index: 10, kind: input, shape index: {}]   ;;  %s2304_s11 = inlined_call_operand.hbm [shape: bf16[128,128], index: 11, kind: input, shape index: {}]   ;;  %s2305_s12 = inlined_call_operand.hbm [shape: bf16[128,128], index: 12, kind: input, shape index: {}]   ;;  %s2306_s13 = inlined_call_operand.hbm [shape: bf16[16,128], index: 13, kind: output, shape index: {}]  }
   0x1   :  { %19 = vsyncpa [#allocation10], 0 }
   0x2   :  { %20 = vsyncpa [#allocation13], 0 }
   0x3   :  { %21 = vsyncpa [#allocation16], 0 }
   0x4   :  { %22 = vsyncpa [#allocation19], 0 }
   0x5   :  { %23 = vsyncpa [#allocation22], 0 }
   0x6   :  { %24 = vsyncpa [#allocation8], 0  ;;  %s1854_s25 = smov [#allocation9]   ;;  %s1598_s29 = scalar_lea.hbm %s2294_s1, 512 }
   0x7   :  { %s42_s26 = sshll.u32 %s1854_s25, 4  ;;  %p1599_p0 = scmp.ne.s32.totalorder %s2294_s1, %s1598_s29  ;;  %s43_s26 = int_to_ptr.vmem [resolvable:$true] %s42_s26 }
   0x8   :  { %p1602_p1 = scmp.lt.u32.totalorder %s1598_s29, %s2294_s1 }
   0xa   :  { %p1604_p2 = pnand %p1602_p1, %p1599_p0 }
   0xc   :  { %1607 = shalt.err (!%p1604_p2)
}
   0xd   :  { %s1608_s17 = scalar_lea.vmem %s43_s26, 512  ;;  %p1613_p4 = scmp.lt.s32.totalorder %s43_s26, %s43_s26 }
   0xe   :  { %p1609_p3 = scmp.ne.s32.totalorder %s43_s26, %s1608_s17  ;;  %p1614_p5 = scmp.lt.s32.totalorder %s1608_s17, %s1608_s17 }
  0x10   :  { %p1615_p6 = por %p1614_p5, %p1613_p4 }
  0x12   :  { %p1616_p7 = pnand %p1615_p6, %p1609_p3 }
  0x14   :  { %1619 = shalt.err (!%p1616_p7)
}
  0x15   :  { %s1855_s18 = smov 128   ;;  %s1856_s19 = smov 8  }
  0x16   :  { %48 = dma.hbm_to_vmem [thread:$0]  %s2294_s1, 512, %s43_s26, [#allocation10], %s1855_s18, %s1855_s18, %s1856_s19  }
  0x17   :  { %s1857_s22 = smov [#allocation12]   ;;  %s1620_s27 = scalar_lea.hbm %s2298_s5, 512 }
  0x18   :  { %s70_s23 = sshll.u32 %s1857_s22, 4  ;;  %p1621_p8 = scmp.ne.s32.totalorder %s2298_s5, %s1620_s27  ;;  %s71_s23 = int_to_ptr.vmem [resolvable:$true] %s70_s23 }
  0x19   :  { %p1624_p9 = scmp.lt.u32.totalorder %s1620_s27, %s2298_s5 }
  0x1b   :  { %p1626_p10 = pnand %p1624_p9, %p1621_p8 }
  0x1d   :  { %1629 = shalt.err (!%p1626_p10)
}
  0x1e   :  { %s1630_s15 = scalar_lea.vmem %s71_s23, 512  ;;  %p1635_p12 = scmp.lt.s32.totalorder %s71_s23, %s71_s23 }
  0x1f   :  { %p1631_p11 = scmp.ne.s32.totalorder %s71_s23, %s1630_s15  ;;  %p1636_p13 = scmp.lt.s32.totalorder %s1630_s15, %s1630_s15 }
  0x21   :  { %p1637_p0 = por %p1636_p13, %p1635_p12 }
  0x23   :  { %p1638_p1 = pnand %p1637_p0, %p1631_p11 }
  0x25   :  { %1641 = shalt.err (!%p1638_p1)
}
  0x26   :  { %76 = dma.hbm_to_vmem [thread:$0]  %s2298_s5, 512, %s71_s23, [#allocation13], %s1855_s18, %s1855_s18, %s1856_s19  }
  0x27   :  { %s1858_s16 = smov [#allocation15]   ;;  %s1859_s20 = smov [#allocation18]  }
  0x28   :  { %s96_s17 = sshll.u32 %s1858_s16, 4  ;;  %s120_s21 = sshll.u32 %s1859_s20, 4  ;;  %s97_s17 = int_to_ptr.vmem [resolvable:$true] %s96_s17  ;;  %s1971_s21 = int_to_ptr.vmem [resolvable:$true] %s120_s21 }
  0x29   :  { %s1642_s25 = scalar_lea.hbm %s2301_s8, 1024 }
  0x2a   :  { %p1643_p2 = scmp.ne.s32.totalorder %s2301_s8, %s1642_s25  ;;  %p1646_p3 = scmp.lt.u32.totalorder %s1642_s25, %s2301_s8 }
  0x2c   :  { %p1648_p4 = pnand %p1646_p3, %p1643_p2 }
  0x2e   :  { %1651 = shalt.err (!%p1648_p4)
}
  0x2f   :  { %s1652_s5 = scalar_lea.vmem %s97_s17, 1024  ;;  %p1657_p6 = scmp.lt.s32.totalorder %s97_s17, %s97_s17 }
  0x30   :  { %p1653_p5 = scmp.ne.s32.totalorder %s97_s17, %s1652_s5  ;;  %p1658_p7 = scmp.lt.s32.totalorder %s1652_s5, %s1652_s5 }
  0x32   :  { %p1659_p8 = por %p1658_p7, %p1657_p6 }
  0x34   :  { %p1660_p9 = pnand %p1659_p8, %p1653_p5 }
  0x36   :  { %1663 = shalt.err (!%p1660_p9)
}
  0x37   :  { %s1860_s23 = smov 64   ;;  %s1861_s14 = smov 4  }
  0x38   :  { %102 = dma.hbm_to_vmem [thread:$0]  %s2301_s8, 1024, %s97_s17, [#allocation16], %s1860_s23, %s1860_s23, %s1861_s14  }
  0x39   :  { %s1664_s20 = scalar_lea.hbm %s2303_s10, 1024 }
  0x3a   :  { %p1665_p10 = scmp.ne.s32.totalorder %s2303_s10, %s1664_s20  ;;  %p1668_p11 = scmp.lt.u32.totalorder %s1664_s20, %s2303_s10 }
  0x3c   :  { %p1670_p12 = pnand %p1668_p11, %p1665_p10 }
  0x3e   :  { %1673 = shalt.err (!%p1670_p12)
}
  0x3f   :  { %s1674_s28 = scalar_lea.vmem %s1971_s21, 1024  ;;  %p1679_p0 = scmp.lt.s32.totalorder %s1971_s21, %s1971_s21 }
  0x40   :  { %p1675_p13 = scmp.ne.s32.totalorder %s1971_s21, %s1674_s28  ;;  %p1680_p1 = scmp.lt.s32.totalorder %s1674_s28, %s1674_s28 }
  0x42   :  { %p1681_p2 = por %p1680_p1, %p1679_p0 }
  0x44   :  { %p1682_p3 = pnand %p1681_p2, %p1675_p13 }
  0x46   :  { %1685 = shalt.err (!%p1682_p3)
}
  0x47   :  { %126 = dma.hbm_to_vmem [thread:$0]  %s2303_s10, 1024, %s1971_s21, [#allocation19], %s1860_s23, %s1860_s23, %s1861_s14  }
  0x48   :  { %s1862_s29 = smov [#allocation6]   ;;  %s1863_s5 = smov [#allocation11]  }
  0x49   :  { %s30_s30 = sshll.u32 %s1862_s29, 4  ;;  %s56_s15 = sshll.u32 %s1863_s5, 4  ;;  %s31_s30 = int_to_ptr.vmem [resolvable:$true] %s30_s30  ;;  %s2008_s15 = int_to_ptr.vmem [resolvable:$true] %s56_s15 }
  0x4a   :  { %s1686_s16 = scalar_lea.hbm %s2293_s0, 128 }
  0x4b   :  { %p1687_p4 = scmp.ne.s32.totalorder %s2293_s0, %s1686_s16  ;;  %p1690_p5 = scmp.lt.u32.totalorder %s1686_s16, %s2293_s0 }
  0x4d   :  { %p1692_p6 = pnand %p1690_p5, %p1687_p4 }
  0x4f   :  { %1695 = shalt.err (!%p1692_p6)
}
  0x50   :  { %s1696_s10 = scalar_lea.vmem %s31_s30, 128  ;;  %p1701_p8 = scmp.lt.s32.totalorder %s31_s30, %s31_s30 }
  0x51   :  { %p1697_p7 = scmp.ne.s32.totalorder %s31_s30, %s1696_s10  ;;  %p1702_p9 = scmp.lt.s32.totalorder %s1696_s10, %s1696_s10 }
  0x53   :  { %p1703_p10 = por %p1702_p9, %p1701_p8 }
  0x55   :  { %p1704_p11 = pnand %p1703_p10, %p1697_p7 }
  0x57   :  { %1707 = shalt.err (!%p1704_p11)
}
  0x58   :  { %36 = dma.hbm_to_vmem [thread:$0]  %s2293_s0, 128, %s31_s30, [#allocation7], %s1860_s23, %s1860_s23, %s1861_s14  }
  0x59   :  { %s1708_s17 = scalar_lea.hbm %s2296_s3, 512 }
  0x5a   :  { %p1709_p12 = scmp.ne.s32.totalorder %s2296_s3, %s1708_s17  ;;  %p1712_p13 = scmp.lt.u32.totalorder %s1708_s17, %s2296_s3 }
  0x5c   :  { %p1714_p0 = pnand %p1712_p13, %p1709_p12 }
  0x5e   :  { %1717 = shalt.err (!%p1714_p0)
}
  0x5f   :  { %s1718_s16 = scalar_lea.vmem %s2008_s15, 512  ;;  %p1723_p2 = scmp.lt.s32.totalorder %s2008_s15, %s2008_s15 }
  0x60   :  { %p1719_p1 = scmp.ne.s32.totalorder %s2008_s15, %s1718_s16  ;;  %p1724_p3 = scmp.lt.s32.totalorder %s1718_s16, %s1718_s16 }
  0x62   :  { %p1725_p4 = por %p1724_p3, %p1723_p2 }
  0x64   :  { %p1726_p5 = pnand %p1725_p4, %p1719_p1 }
  0x66   :  { %1729 = shalt.err (!%p1726_p5)
}
  0x67   :  { %62 = dma.hbm_to_vmem [thread:$0]  %s2296_s3, 512, %s2008_s15, [#allocation10], %s1855_s18, %s1855_s18, %s1856_s19  }
  0x68   :  { %s1864_s20 = smov [#allocation14]   ;;  %s1865_s24 = smov [#allocation17]  }
  0x69   :  { %s84_s22 = sshll.u32 %s1864_s20, 4  ;;  %s108_s25 = sshll.u32 %s1865_s24, 4  ;;  %s85_s22 = int_to_ptr.vmem [resolvable:$true] %s84_s22  ;;  %s2045_s25 = int_to_ptr.vmem [resolvable:$true] %s108_s25 }
  0x6a   :  { %s1730_s27 = scalar_lea.hbm %s2300_s7, 1024 }
  0x6b   :  { %p1731_p6 = scmp.ne.s32.totalorder %s2300_s7, %s1730_s27  ;;  %p1734_p7 = scmp.lt.u32.totalorder %s1730_s27, %s2300_s7 }
  0x6d   :  { %p1736_p8 = pnand %p1734_p7, %p1731_p6 }
  0x6f   :  { %1739 = shalt.err (!%p1736_p8)
}
  0x70   :  { %s1740_s3 = scalar_lea.vmem %s85_s22, 1024  ;;  %p1745_p10 = scmp.lt.s32.totalorder %s85_s22, %s85_s22 }
  0x71   :  { %p1741_p9 = scmp.ne.s32.totalorder %s85_s22, %s1740_s3  ;;  %p1746_p11 = scmp.lt.s32.totalorder %s1740_s3, %s1740_s3 }
  0x73   :  { %p1747_p12 = por %p1746_p11, %p1745_p10 }
  0x75   :  { %p1748_p13 = pnand %p1747_p12, %p1741_p9 }
  0x77   :  { %1751 = shalt.err (!%p1748_p13)
}
  0x78   :  { %90 = dma.hbm_to_vmem [thread:$0]  %s2300_s7, 1024, %s85_s22, [#allocation13], %s1860_s23, %s1860_s23, %s1861_s14  }
  0x79   :  { %s1752_s1 = scalar_lea.hbm %s2302_s9, 1024 }
  0x7a   :  { %p1753_p0 = scmp.ne.s32.totalorder %s2302_s9, %s1752_s1  ;;  %p1756_p1 = scmp.lt.u32.totalorder %s1752_s1, %s2302_s9 }
  0x7c   :  { %p1758_p2 = pnand %p1756_p1, %p1753_p0 }
  0x7e   :  { %1761 = shalt.err (!%p1758_p2)
}
  0x7f   :  { %s1762_s20 = scalar_lea.vmem %s2045_s25, 1024  ;;  %p1767_p4 = scmp.lt.s32.totalorder %s2045_s25, %s2045_s25 }
  0x80   :  { %p1763_p3 = scmp.ne.s32.totalorder %s2045_s25, %s1762_s20  ;;  %p1768_p5 = scmp.lt.s32.totalorder %s1762_s20, %s1762_s20 }
  0x82   :  { %p1769_p6 = por %p1768_p5, %p1767_p4 }
  0x84   :  { %p1770_p7 = pnand %p1769_p6, %p1763_p3 }
  0x86   :  { %1773 = shalt.err (!%p1770_p7)
}
  0x87   :  { %114 = dma.hbm_to_vmem [thread:$0]  %s2302_s9, 1024, %s2045_s25, [#allocation16], %s1860_s23, %s1860_s23, %s1861_s14  }
  0x88   :  { %s1866_s24 = smov [#allocation20]   ;;  %s1867_s21 = smov [#allocation21]  }
  0x89   :  { %s132_s10 = sshll.u32 %s1866_s24, 4  ;;  %s144_s27 = sshll.u32 %s1867_s21, 4  ;;  %s133_s10 = int_to_ptr.vmem [resolvable:$true] %s132_s10  ;;  %s2082_s27 = int_to_ptr.vmem [resolvable:$true] %s144_s27 }
  0x8a   :  { %s1774_s17 = scalar_lea.hbm %s2304_s11, 1024 }
  0x8b   :  { %p1775_p8 = scmp.ne.s32.totalorder %s2304_s11, %s1774_s17  ;;  %p1778_p9 = scmp.lt.u32.totalorder %s1774_s17, %s2304_s11 }
  0x8d   :  { %p1780_p10 = pnand %p1778_p9, %p1775_p8 }
  0x8f   :  { %1783 = shalt.err (!%p1780_p10)
}
  0x90   :  { %s1784_s9 = scalar_lea.vmem %s133_s10, 1024  ;;  %p1789_p12 = scmp.lt.s32.totalorder %s133_s10, %s133_s10 }
  0x91   :  { %p1785_p11 = scmp.ne.s32.totalorder %s133_s10, %s1784_s9  ;;  %p1790_p13 = scmp.lt.s32.totalorder %s1784_s9, %s1784_s9 }
  0x93   :  { %p1791_p0 = por %p1790_p13, %p1789_p12 }
  0x95   :  { %p1792_p1 = pnand %p1791_p0, %p1785_p11 }
  0x97   :  { %1795 = shalt.err (!%p1792_p1)
}
  0x98   :  { %138 = dma.hbm_to_vmem [thread:$0]  %s2304_s11, 1024, %s133_s10, [#allocation19], %s1860_s23, %s1860_s23, %s1861_s14  }
  0x99   :  { %s1796_s26 = scalar_lea.hbm %s2305_s12, 1024 }
  0x9a   :  { %p1797_p2 = scmp.ne.s32.totalorder %s2305_s12, %s1796_s26  ;;  %p1800_p3 = scmp.lt.u32.totalorder %s1796_s26, %s2305_s12 }
  0x9c   :  { %p1802_p4 = pnand %p1800_p3, %p1797_p2 }
  0x9e   :  { %1805 = shalt.err (!%p1802_p4)
}
  0x9f   :  { %s1806_s7 = scalar_lea.vmem %s2082_s27, 1024  ;;  %p1811_p6 = scmp.lt.s32.totalorder %s2082_s27, %s2082_s27 }
  0xa0   :  { %p1807_p5 = scmp.ne.s32.totalorder %s2082_s27, %s1806_s7  ;;  %p1812_p7 = scmp.lt.s32.totalorder %s1806_s7, %s1806_s7 }
  0xa2   :  { %p1813_p8 = por %p1812_p7, %p1811_p6 }
  0xa4   :  { %p1814_p9 = pnand %p1813_p8, %p1807_p5 }
  0xa6   :  { %1817 = shalt.err (!%p1814_p9)
}
  0xa7   :  { %150 = dma.hbm_to_vmem [thread:$0]  %s2305_s12, 1024, %s2082_s27, [#allocation22], %s1860_s23, %s1860_s23, %s1861_s14  }
  0xa8   :  { %1840 = dma.done.wait [#allocation7], 128  }
  0xa9   :  { %1841 = vsyncadd [#allocation7], 4294967168 }
  0xaa   :  { %1842 = dma.done.wait [#allocation10], 1024  }
  0xab   :  { %1843 = vsyncadd [#allocation10], 4294966272 }
  0xac   :  { %1844 = dma.done.wait [#allocation13], 1536  }
  0xad   :  { %1845 = vsyncadd [#allocation13], 4294965760 }
  0xae   :  { %1846 = dma.done.wait [#allocation16], 2048  }
  0xaf   :  { %1847 = vsyncadd [#allocation16], 4294965248 }
  0xb0   :  { %1848 = dma.done.wait [#allocation19], 2048  }
  0xb1   :  { %1849 = vsyncadd [#allocation19], 4294965248 }
  0xb2   :  { %1850 = dma.done.wait [#allocation22], 1024  }
  0xb3   :  { %1851 = vsyncadd [#allocation22], 4294966272  ;;  %v1868_v0 = vmov 0.0   ;;  %vm1869_vm0 = vmmov 0   ;;  %v1541_v1 = vld [vmem:[#allocation14] sm:$0xff]   ;;  %v1543_v3 = vld [vmem:[#allocation14 + $0x8] sm:$0xff]  }
  0xb4   :  { %1332 = vmatprep.subr.bf16.mxu0 %v1868_v0  ;;  %1352 = vmatprep.subr.bf16.mxu1 %v1868_v0  ;;  %v1542_v2 = vld [vmem:[#allocation17] sm:$0xff]   ;;  %v1544_v4 = vld [vmem:[#allocation17 + $0x8] sm:$0xff]   ;;  %v1545_v5 = vld [vmem:[#allocation14 + $0x10] sm:$0xff]  }
  0xb5   :  { %1348 = vmatprep.mubr.msk.bf16.mxu0 %vm1869_vm0, %v1868_v0  ;;  %1368 = vmatprep.mubr.msk.bf16.mxu1 %vm1869_vm0, %v1868_v0  ;;  %v1546_v6 = vld [vmem:[#allocation17 + $0x10] sm:$0xff]   ;;  %v1547_v7 = vld [vmem:[#allocation14 + $0x18] sm:$0xff]   ;;  %v1549_v9 = vld [vmem:[#allocation14 + $0x20] sm:$0xff]  }
  0xb6   :  { %1333 = vmatpush3.bf16.msra.mxu0 %v1541_v1  ;;  %1353 = vmatpush3.bf16.msra.mxu1 %v1542_v2  ;;  %v1548_v8 = vld [vmem:[#allocation17 + $0x18] sm:$0xff]   ;;  %v1550_v10 = vld [vmem:[#allocation17 + $0x20] sm:$0xff]   ;;  %v1551_v11 = vld [vmem:[#allocation14 + $0x28] sm:$0xff]  }
  0xb7   :  { %1334 = vmatprep.subr.bf16.mxu0 %v1868_v0  ;;  %1354 = vmatprep.subr.bf16.mxu1 %v1868_v0  ;;  %v1552_v12 = vld [vmem:[#allocation17 + $0x28] sm:$0xff]   ;;  %v1553_v13 = vld [vmem:[#allocation14 + $0x30] sm:$0xff]   ;;  %v1555_v15 = vld [vmem:[#allocation14 + $0x38] sm:$0xff]  }
  0xb8   :  { %v1554_v14 = vld [vmem:[#allocation17 + $0x30] sm:$0xff]   ;;  %v1556_v16 = vld [vmem:[#allocation17 + $0x38] sm:$0xff]   ;;  %v1558_v18 = vld [vmem:[#allocation15] sm:$0xff]  }
  0xb9   :  { %v2139_v17 = vld [vmem:[#allocation6] sm:$0xff]   ;;  %v1559_v19 = vld [vmem:[#allocation18] sm:$0xff]   ;;  %v1560_v20 = vld [vmem:[#allocation15 + $0x8] sm:$0xff]  }
  0xba   :  { %1335 = vmatpush3.bf16.msra.mxu0 %v1543_v3  ;;  %1355 = vmatpush3.bf16.msra.mxu1 %v1544_v4  ;;  %v1561_v21 = vld [vmem:[#allocation18 + $0x8] sm:$0xff]   ;;  %v1562_v22 = vld [vmem:[#allocation15 + $0x10] sm:$0xff]   ;;  %v1564_v24 = vld [vmem:[#allocation15 + $0x18] sm:$0xff]  }
  0xbb   :  { %1336 = vmatprep.subr.bf16.mxu0 %v1868_v0  ;;  %1356 = vmatprep.subr.bf16.mxu1 %v1868_v0  ;;  %v1563_v23 = vld [vmem:[#allocation18 + $0x10] sm:$0xff]   ;;  %v1565_v25 = vld [vmem:[#allocation18 + $0x18] sm:$0xff]   ;;  %v1566_v26 = vld [vmem:[#allocation15 + $0x20] sm:$0xff]  }
  0xbc   :  { %v1567_v27 = vld [vmem:[#allocation18 + $0x20] sm:$0xff]   ;;  %v1568_v28 = vld [vmem:[#allocation15 + $0x28] sm:$0xff]   ;;  %v1570_v30 = vld [vmem:[#allocation15 + $0x30] sm:$0xff]  }
  0xbd   :  { %v1569_v29 = vld [vmem:[#allocation18 + $0x28] sm:$0xff]   ;;  %v1571_v31 = vld [vmem:[#allocation18 + $0x30] sm:$0xff]   ;;  %v1572_v32 = vld [vmem:[#allocation15 + $0x38] sm:$0xff]  }
  0xbe   :  { %1337 = vmatpush3.bf16.msra.mxu0 %v1545_v5  ;;  %1357 = vmatpush3.bf16.msra.mxu1 %v1546_v6  ;;  %v1573_v33 = vld [vmem:[#allocation18 + $0x38] sm:$0xff]   ;;  %v412_v34 = vld [vmem:[#allocation9] sm:$0xff]  ;;  %v413_v46 = vld [vmem:[#allocation9 + $0x8] sm:$0xff] }
  0xbf   :  { %1338 = vmatprep.subr.bf16.mxu0 %v1868_v0  ;;  %1358 = vmatprep.subr.bf16.mxu1 %v1868_v0  ;;  %v463_v35 = vld [vmem:[#allocation11] sm:$0xff]  ;;  %v417_v36 = vunpack.c.0.f8e4m3fn %v412_v34  ;;  %v418_v37 = vunpack.c.1.f8e4m3fn %v412_v34  ;;  %v2168_v38 = vld [vmem:[%s2295_s2] ss:$0 sm:$0xff]  ;;  %v419_v44 = vunpack.c.2.f8e4m3fn %v412_v34  ;;  %v420_v45 = vunpack.c.3.f8e4m3fn %v412_v34  ;;  %v464_v47 = vld [vmem:[#allocation11 + $0x8] sm:$0xff] }
  0xc0   :  { %v468_v39 = vunpack.c.0.f8e4m3fn %v463_v35  ;;  %v469_v40 = vunpack.c.1.f8e4m3fn %v463_v35  ;;  %v2173_v41 = vld [vmem:[%s2297_s4] ss:$0 sm:$0xff]  ;;  %v470_v50 = vunpack.c.2.f8e4m3fn %v463_v35  ;;  %v471_v51 = vunpack.c.3.f8e4m3fn %v463_v35 }
  0xc1   :  { %v439_v42 = vmul.f32 %v2168_v38, %v417_v36  ;;  %v440_v43 = vmul.f32 %v2168_v38, %v418_v37  ;;  %v421_v55 = vunpack.c.0.f8e4m3fn %v413_v46  ;;  %v422_v56 = vunpack.c.1.f8e4m3fn %v413_v46 }
  0xc2   :  { %1339 = vmatpush3.bf16.msra.mxu0 %v1547_v7  ;;  %1359 = vmatpush3.bf16.msra.mxu1 %v1548_v8  ;;  %v490_v48 = vmul.f32 %v2173_v41, %v468_v39  ;;  %v491_v49 = vmul.f32 %v2173_v41, %v469_v40  ;;  %v472_v57 = vunpack.c.0.f8e4m3fn %v464_v47  ;;  %v473_v58 = vunpack.c.1.f8e4m3fn %v464_v47 }
  0xc3   :  { %1340 = vmatprep.subr.bf16.mxu0 %v1868_v0  ;;  %1360 = vmatprep.subr.bf16.mxu1 %v1868_v0  ;;  %v455_v61 = vpack.c.bf16 %v440_v43, %v439_v42  ;;  %v441_v62 = vmul.f32 %v2168_v38, %v419_v44  ;;  %v442_v63 = vmul.f32 %v2168_v38, %v420_v45  ;;  %v415_v44 = vld [vmem:[#allocation9 + $0x18] sm:$0xff] }
  0xc4   :  { %v506_v4 = vpack.c.bf16 %v491_v49, %v490_v48  ;;  %v492_v5 = vmul.f32 %v2173_v41, %v470_v50  ;;  %v493_v6 = vmul.f32 %v2173_v41, %v471_v51  ;;  %v466_v45 = vld [vmem:[#allocation11 + $0x18] sm:$0xff]  ;;  %v429_v51 = vunpack.c.0.f8e4m3fn %v415_v44 }
  0xc6   :  { %1341 = vmatpush3.bf16.msra.mxu0 %v1549_v9  ;;  %1361 = vmatpush3.bf16.msra.mxu1 %v1550_v10  ;;  %v443_v9 = vmul.f32 %v2168_v38, %v421_v55  ;;  %v444_v10 = vmul.f32 %v2168_v38, %v422_v56  ;;  %v481_v55 = vunpack.c.1.f8e4m3fn %v466_v45 }
  0xc7   :  { %1342 = vmatprep.subr.bf16.mxu0 %v1868_v0  ;;  %1362 = vmatprep.subr.bf16.mxu1 %v1868_v0 }
  0xca   :  { %1343 = vmatpush3.bf16.msra.mxu0 %v1551_v11  ;;  %1363 = vmatpush3.bf16.msra.mxu1 %v1552_v12  ;;  %v494_v11 = vmul.f32 %v2173_v41, %v472_v57  ;;  %v495_v12 = vmul.f32 %v2173_v41, %v473_v58  ;;  %v451_v58 = vmul.f32 %v2168_v38, %v429_v51  ;;  %v1579_v51 = vld [vmem:[#allocation20 + $0x28] sm:$0xff]  }
  0xcb   :  { %1344 = vmatprep.subr.bf16.mxu0 %v1868_v0  ;;  %1364 = vmatprep.subr.bf16.mxu1 %v1868_v0 }
  0xce   :  { %1345 = vmatpush3.bf16.msra.mxu0 %v1553_v13  ;;  %1365 = vmatpush3.bf16.msra.mxu1 %v1554_v14  ;;  %v456_v13 = vpack.c.bf16 %v442_v63, %v441_v62  ;;  %v423_v14 = vunpack.c.2.f8e4m3fn %v413_v46  ;;  %v503_v63 = vmul.f32 %v2173_v41, %v481_v55 }
  0xcf   :  { %1346 = vmatprep.subr.bf16.mxu0 %v1868_v0  ;;  %1366 = vmatprep.subr.bf16.mxu1 %v1868_v0 }
  0xd2   :  { %1347 = vmatpush3.bf16.msra.mxu0 %v1555_v15  ;;  %1367 = vmatpush3.bf16.msra.mxu1 %v1556_v16  ;;  %v424_v15 = vunpack.c.3.f8e4m3fn %v413_v46  ;;  %v507_v16 = vpack.c.bf16 %v493_v6, %v492_v5 }
  0xd3   :  { %1372 = vmatprep.subr.bf16.mxu0 %v1868_v0  ;;  %1412 = vmatprep.subr.bf16.mxu1 %v1868_v0 }
  0xd5   :  { %1349 = vmatmul.mubr.bf16.vlgmr.msra.gmra.mrb[0].mxu0 %v2139_v17  ;;  %1369 = vmatmul.mubr.bf16.vlgmr.msra.gmra.mrb[0].mxu1 %v2139_v17 }
  0xd6   :  { %1373 = vmatpush3.bf16.msra.mxu0 %v1558_v18  ;;  %1413 = vmatpush3.bf16.msra.mxu1 %v1559_v19  ;;  %v474_v18 = vunpack.c.2.f8e4m3fn %v464_v47  ;;  %v475_v19 = vunpack.c.3.f8e4m3fn %v464_v47 }
  0xd7   :  { %1374 = vmatprep.subr.bf16.mxu0 %v1868_v0  ;;  %1414 = vmatprep.subr.bf16.mxu1 %v1868_v0 }
  0xd8   :  { %1388 = vmatprep.mubr.msk.bf16.mxu0 %vm1869_vm0, %v1868_v0  ;;  %1428 = vmatprep.mubr.msk.bf16.mxu1 %vm1869_vm0, %v1868_v0 }
  0xda   :  { %1375 = vmatpush3.bf16.msra.mxu0 %v1560_v20  ;;  %1415 = vmatpush3.bf16.msra.mxu1 %v1561_v21  ;;  %v414_v20 = vld [vmem:[#allocation9 + $0x10] sm:$0xff] }
  0xdb   :  { %1376 = vmatprep.subr.bf16.mxu0 %v1868_v0  ;;  %1416 = vmatprep.subr.bf16.mxu1 %v1868_v0  ;;  %v465_v21 = vld [vmem:[#allocation11 + $0x10] sm:$0xff] }
  0xdc   :  { %v478_v34 = vunpack.c.2.f8e4m3fn %v465_v21  ;;  %v479_v35 = vunpack.c.3.f8e4m3fn %v465_v21 }
  0xde   :  { %1377 = vmatpush3.bf16.msra.mxu0 %v1562_v22  ;;  %1417 = vmatpush3.bf16.msra.mxu1 %v1563_v23  ;;  %v457_v22 = vpack.c.bf16 %v444_v10, %v443_v9  ;;  %v508_v23 = vpack.c.bf16 %v495_v12, %v494_v11  ;;  %v500_v48 = vmul.f32 %v2173_v41, %v478_v34  ;;  %v2236_v12 = vld [vmem:[%s2299_s6] ss:$0 sm:$0xff]  ;;  %v833_v34 = vld [vmem:[#allocation12 + $0x10] sm:$0xff]  ;;  %s1870_s6 = smov [#allocation23]  }
  0xdf   :  { %1378 = vmatprep.subr.bf16.mxu0 %v1868_v0  ;;  %1418 = vmatprep.subr.bf16.mxu1 %v1868_v0  ;;  %v501_v49 = vmul.f32 %v2173_v41, %v479_v35  ;;  %s1170_s27 = sshll.u32 %s1870_s6, 4  ;;  %s1171_s27 = int_to_ptr.vmem [resolvable:$true] %s1170_s27 }
  0xe0   :  { %s1818_s28 = scalar_lea.vmem %s1171_s27, 128  ;;  %p1823_p11 = scmp.lt.s32.totalorder %s1171_s27, %s1171_s27 }
  0xe1   :  { %v511_v57 = vpack.c.bf16 %v501_v49, %v500_v48  ;;  %v834_v49 = vld [vmem:[#allocation12 + $0x18] sm:$0xff]  ;;  %p1819_p10 = scmp.ne.s32.totalorder %s1171_s27, %s1818_s28  ;;  %p1824_p12 = scmp.lt.s32.totalorder %s1818_s28, %s1818_s28 }
  0xe2   :  { %1379 = vmatpush3.bf16.msra.mxu0 %v1564_v24  ;;  %1419 = vmatpush3.bf16.msra.mxu1 %v1565_v25  ;;  %v445_v24 = vmul.f32 %v2168_v38, %v423_v14  ;;  %v446_v25 = vmul.f32 %v2168_v38, %v424_v15 }
  0xe3   :  { %1380 = vmatprep.subr.bf16.mxu0 %v1868_v0  ;;  %1420 = vmatprep.subr.bf16.mxu1 %v1868_v0  ;;  %p1825_p13 = por %p1824_p12, %p1823_p11 }
  0xe4   :  { %v458_v36 = vpack.c.bf16 %v446_v25, %v445_v24 }
  0xe5   :  { %p1826_p0 = pnand %p1825_p13, %p1819_p10 }
  0xe6   :  { %1381 = vmatpush3.bf16.msra.mxu0 %v1566_v26  ;;  %1421 = vmatpush3.bf16.msra.mxu1 %v1567_v27  ;;  %v425_v26 = vunpack.c.0.f8e4m3fn %v414_v20  ;;  %v426_v27 = vunpack.c.1.f8e4m3fn %v414_v20 }
  0xe7   :  { %1382 = vmatprep.subr.bf16.mxu0 %v1868_v0  ;;  %1422 = vmatprep.subr.bf16.mxu1 %v1868_v0 }
  0xe8   :  { %v447_v37 = vmul.f32 %v2168_v38, %v425_v26  ;;  %v448_v39 = vmul.f32 %v2168_v38, %v426_v27 }
  0xea   :  { %1383 = vmatpush3.bf16.msra.mxu0 %v1568_v28  ;;  %1423 = vmatpush3.bf16.msra.mxu1 %v1569_v29  ;;  %v496_v28 = vmul.f32 %v2173_v41, %v474_v18  ;;  %v497_v29 = vmul.f32 %v2173_v41, %v475_v19  ;;  %v459_v50 = vpack.c.bf16 %v448_v39, %v447_v37  ;;  %v844_v37 = vunpack.c.0.f8e4m3fn %v833_v34 }
  0xeb   :  { %1384 = vmatprep.subr.bf16.mxu0 %v1868_v0  ;;  %1424 = vmatprep.subr.bf16.mxu1 %v1868_v0  ;;  %v845_v39 = vunpack.c.1.f8e4m3fn %v833_v34 }
  0xec   :  { %v509_v40 = vpack.c.bf16 %v497_v29, %v496_v28  ;;  %v1576_v29 = vld [vmem:[#allocation20 + $0x10] sm:$0xff]  }
  0xee   :  { %1385 = vmatpush3.bf16.msra.mxu0 %v1570_v30  ;;  %1425 = vmatpush3.bf16.msra.mxu1 %v1571_v31  ;;  %v476_v30 = vunpack.c.0.f8e4m3fn %v465_v21  ;;  %v477_v31 = vunpack.c.1.f8e4m3fn %v465_v21  ;;  %v832_v21 = vld [vmem:[#allocation12 + $0x8] sm:$0xff] }
  0xef   :  { %1386 = vmatprep.subr.bf16.mxu0 %v1868_v0  ;;  %1426 = vmatprep.subr.bf16.mxu1 %v1868_v0  ;;  %v840_v24 = vunpack.c.0.f8e4m3fn %v832_v21  ;;  %v841_v25 = vunpack.c.1.f8e4m3fn %v832_v21 }
  0xf0   :  { %v498_v42 = vmul.f32 %v2173_v41, %v476_v30  ;;  %v499_v43 = vmul.f32 %v2173_v41, %v477_v31  ;;  %v842_v30 = vunpack.c.2.f8e4m3fn %v832_v21  ;;  %v843_v31 = vunpack.c.3.f8e4m3fn %v832_v21  ;;  %v1583_v21 = vld [vmem:[#allocation21 + $0x8] sm:$0xff]  }
  0xf1   :  { %v862_v26 = vmul.f32 %v2236_v12, %v840_v24  ;;  %v863_v27 = vmul.f32 %v2236_v12, %v841_v25  ;;  %v1586_v24 = vld [vmem:[#allocation21 + $0x20] sm:$0xff]   ;;  %v1587_v25 = vld [vmem:[#allocation21 + $0x28] sm:$0xff]  }
  0xf2   :  { %1387 = vmatpush3.bf16.msra.mxu0 %v1572_v32  ;;  %1427 = vmatpush3.bf16.msra.mxu1 %v1573_v33  ;;  %v427_v32 = vunpack.c.2.f8e4m3fn %v414_v20  ;;  %v428_v33 = vunpack.c.3.f8e4m3fn %v414_v20 }
  0xf3   :  { %1392 = vmatprep.subr.bf16.mxu0 %v1868_v0  ;;  %1432 = vmatprep.subr.bf16.mxu1 %v1868_v0  ;;  %v876_v28 = vpack.c.bf16 %v863_v27, %v862_v26  ;;  %v1588_v26 = vld [vmem:[#allocation21 + $0x30] sm:$0xff]   ;;  %v1589_v27 = vld [vmem:[#allocation21 + $0x38] sm:$0xff]  }
  0xf4   :  { %v449_v46 = vmul.f32 %v2168_v38, %v427_v32  ;;  %v450_v47 = vmul.f32 %v2168_v38, %v428_v33  ;;  %v864_v32 = vmul.f32 %v2236_v12, %v842_v30  ;;  %v865_v33 = vmul.f32 %v2236_v12, %v843_v31 }
  0xf6   :  { %v460_v56 = vpack.c.bf16 %v450_v47, %v449_v46  ;;  %v877_v35 = vpack.c.bf16 %v865_v33, %v864_v32  ;;  %v847_v46 = vunpack.c.3.f8e4m3fn %v833_v34 }
  0xf8   :  { %v869_v48 = vmul.f32 %v2236_v12, %v847_v46 }
 0x1a8   :  { %v296_v52 = vpop.f32.mrb[0].mxu0  ;;  %v403_v53 = vpop.f32.mrb[0].mxu1 }
 0x1a9   :  { %v1350_v54 = vpop.f32.mrb[1].mxu0  ;;  %v1370_v59 = vpop.f32.mrb[1].mxu1 }
 0x1aa   :  { %v299_v60 = vpop.f32.mrb[2].mxu0  ;;  %v406_v2 = vpop.f32.mrb[2].mxu1  ;;  %v480_v54 = vunpack.c.0.f8e4m3fn %v466_v45 }
 0x1ab   :  { %v303_v1 = vpack.c.bf16 %v299_v60, %v296_v52  ;;  %v1351_v3 = vpop.f32.mrb[3].mxu0  ;;  %v410_v7 = vpack.c.bf16 %v406_v2, %v403_v53  ;;  %v1371_v8 = vpop.f32.mrb[3].mxu1  ;;  %v430_v52 = vunpack.c.1.f8e4m3fn %v415_v44  ;;  %v510_v53 = vpack.c.bf16 %v499_v43, %v498_v42 }
 0x1ac   :  { %v431_v60 = vunpack.c.2.f8e4m3fn %v415_v44  ;;  %v502_v62 = vmul.f32 %v2173_v41, %v480_v54  ;;  %v483_v2 = vunpack.c.3.f8e4m3fn %v466_v45  ;;  %v867_v42 = vmul.f32 %v2236_v12, %v845_v39 }
 0x1ad   :  { %1389 = vmatmul.mubr.bf16.vlgmr.msra.gmra.mrb[4].mxu0 %v303_v1  ;;  %1429 = vmatmul.mubr.bf16.vlgmr.msra.gmra.mrb[4].mxu1 %v410_v7  ;;  %v452_v59 = vmul.f32 %v2168_v38, %v430_v52  ;;  %v482_v1 = vunpack.c.2.f8e4m3fn %v466_v45  ;;  %v846_v45 = vunpack.c.2.f8e4m3fn %v833_v34  ;;  %v848_v52 = vunpack.c.0.f8e4m3fn %v834_v49 }
 0x1ae   :  { %1393 = vmatpush3.bf16.msra.mxu0 %v455_v61  ;;  %1433 = vmatpush3.bf16.msra.mxu1 %v506_v4  ;;  %v432_v61 = vunpack.c.3.f8e4m3fn %v415_v44  ;;  %v453_v4 = vmul.f32 %v2168_v38, %v431_v60  ;;  %v512_v6 = vpack.c.bf16 %v503_v63, %v502_v62  ;;  %v505_v8 = vmul.f32 %v2173_v41, %v483_v2  ;;  %v1578_v44 = vld [vmem:[#allocation20 + $0x20] sm:$0xff]   ;;  %v1581_v63 = vld [vmem:[#allocation20 + $0x38] sm:$0xff]  }
 0x1af   :  { %1394 = vmatprep.subr.bf16.mxu0 %v1868_v0  ;;  %1434 = vmatprep.subr.bf16.mxu1 %v1868_v0  ;;  %v461_v3 = vpack.c.bf16 %v452_v59, %v451_v58  ;;  %v504_v7 = vmul.f32 %v2173_v41, %v482_v1  ;;  %v868_v47 = vmul.f32 %v2236_v12, %v846_v45  ;;  %v850_v58 = vunpack.c.2.f8e4m3fn %v834_v49 }
 0x1b0   :  { %1408 = vmatprep.mubr.msk.bf16.mxu0 %vm1869_vm0, %v1868_v0  ;;  %1448 = vmatprep.mubr.msk.bf16.mxu1 %vm1869_vm0, %v1868_v0  ;;  %v454_v5 = vmul.f32 %v2168_v38, %v432_v61  ;;  %v831_v38 = vld [vmem:[#allocation12] sm:$0xff]  ;;  %v870_v54 = vmul.f32 %v2236_v12, %v848_v52  ;;  %v851_v59 = vunpack.c.3.f8e4m3fn %v834_v49 }
 0x1b1   :  { %v513_v10 = vpack.c.bf16 %v505_v8, %v504_v7  ;;  %v836_v41 = vunpack.c.0.f8e4m3fn %v831_v38  ;;  %v837_v11 = vunpack.c.1.f8e4m3fn %v831_v38  ;;  %v839_v18 = vunpack.c.3.f8e4m3fn %v831_v38 }
 0x1b2   :  { %1395 = vmatpush3.bf16.msra.mxu0 %v456_v13  ;;  %1435 = vmatpush3.bf16.msra.mxu1 %v507_v16  ;;  %v462_v9 = vpack.c.bf16 %v454_v5, %v453_v4  ;;  %v838_v16 = vunpack.c.2.f8e4m3fn %v831_v38  ;;  %v872_v60 = vmul.f32 %v2236_v12, %v850_v58  ;;  %v873_v61 = vmul.f32 %v2236_v12, %v851_v59 }
 0x1b3   :  { %1396 = vmatprep.subr.bf16.mxu0 %v1868_v0  ;;  %1436 = vmatprep.subr.bf16.mxu1 %v1868_v0  ;;  %v858_v13 = vmul.f32 %v2236_v12, %v836_v41  ;;  %v859_v14 = vmul.f32 %v2236_v12, %v837_v11  ;;  %v861_v20 = vmul.f32 %v2236_v12, %v839_v18 }
 0x1b4   :  { %v860_v19 = vmul.f32 %v2236_v12, %v838_v16  ;;  %v881_v62 = vpack.c.bf16 %v873_v61, %v872_v60 }
 0x1b5   :  { %v874_v15 = vpack.c.bf16 %v859_v14, %v858_v13 }
 0x1b6   :  { %1397 = vmatpush3.bf16.msra.mxu0 %v457_v22  ;;  %1437 = vmatpush3.bf16.msra.mxu1 %v508_v23  ;;  %v875_v22 = vpack.c.bf16 %v861_v20, %v860_v19  ;;  %v1575_v23 = vld [vmem:[#allocation20 + $0x8] sm:$0xff]   ;;  %v1582_v19 = vld [vmem:[#allocation21] sm:$0xff]  }
 0x1b7   :  { %1398 = vmatprep.subr.bf16.mxu0 %v1868_v0  ;;  %1438 = vmatprep.subr.bf16.mxu1 %v1868_v0 }
 0x1ba   :  { %1399 = vmatpush3.bf16.msra.mxu0 %v458_v36  ;;  %1439 = vmatpush3.bf16.msra.mxu1 %v509_v40  ;;  %v1577_v36 = vld [vmem:[#allocation20 + $0x18] sm:$0xff]   ;;  %v866_v40 = vmul.f32 %v2236_v12, %v844_v37 }
 0x1bb   :  { %1400 = vmatprep.subr.bf16.mxu0 %v1868_v0  ;;  %1440 = vmatprep.subr.bf16.mxu1 %v1868_v0 }
 0x1bc   :  { %v878_v43 = vpack.c.bf16 %v867_v42, %v866_v40 }
 0x1be   :  { %1401 = vmatpush3.bf16.msra.mxu0 %v459_v50  ;;  %1441 = vmatpush3.bf16.msra.mxu1 %v510_v53  ;;  %v879_v50 = vpack.c.bf16 %v869_v48, %v868_v47  ;;  %v849_v53 = vunpack.c.1.f8e4m3fn %v834_v49 }
 0x1bf   :  { %1402 = vmatprep.subr.bf16.mxu0 %v1868_v0  ;;  %1442 = vmatprep.subr.bf16.mxu1 %v1868_v0 }
 0x1c0   :  { %v871_v55 = vmul.f32 %v2236_v12, %v849_v53 }
 0x1c2   :  { %1403 = vmatpush3.bf16.msra.mxu0 %v460_v56  ;;  %1443 = vmatpush3.bf16.msra.mxu1 %v511_v57  ;;  %v880_v56 = vpack.c.bf16 %v871_v55, %v870_v54  ;;  %v1580_v57 = vld [vmem:[#allocation20 + $0x30] sm:$0xff]  }
 0x1c3   :  { %1404 = vmatprep.subr.bf16.mxu0 %v1868_v0  ;;  %1444 = vmatprep.subr.bf16.mxu1 %v1868_v0 }
 0x1c6   :  { %1405 = vmatpush3.bf16.msra.mxu0 %v461_v3  ;;  %1445 = vmatpush3.bf16.msra.mxu1 %v512_v6 }
 0x1c7   :  { %1406 = vmatprep.subr.bf16.mxu0 %v1868_v0  ;;  %1446 = vmatprep.subr.bf16.mxu1 %v1868_v0 }
 0x1ca   :  { %1407 = vmatpush3.bf16.msra.mxu0 %v462_v9  ;;  %1447 = vmatpush3.bf16.msra.mxu1 %v513_v10 }
 0x1cb   :  { %1452 = vmatprep.subr.bf16.mxu0 %v1868_v0  ;;  %1472 = vmatprep.subr.bf16.mxu1 %v1868_v0 }
 0x1cd   :  { %1409 = vmatmul.mubr.bf16.vlgmr.msra.gmra.mrb[4].mxu0 %v2139_v17  ;;  %1449 = vmatmul.mubr.bf16.vlgmr.msra.gmra.mrb[4].mxu1 %v2139_v17  ;;  %v1574_v17 = vld [vmem:[#allocation20] sm:$0xff]  }
 0x1ce   :  { %1468 = vmatprep.mubr.msk.bf16.mxu0 %vm1869_vm0, %v1868_v0  ;;  %1488 = vmatprep.mubr.msk.bf16.mxu1 %vm1869_vm0, %v1868_v0 }
 0x1cf   :  { %1453 = vmatpush3.bf16.msra.mxu0 %v874_v15  ;;  %1473 = vmatpush3.bf16.msra.mxu1 %v1574_v17 }
 0x1d0   :  { %1454 = vmatprep.subr.bf16.mxu0 %v1868_v0  ;;  %1474 = vmatprep.subr.bf16.mxu1 %v1868_v0 }
 0x1d3   :  { %1455 = vmatpush3.bf16.msra.mxu0 %v875_v22  ;;  %1475 = vmatpush3.bf16.msra.mxu1 %v1575_v23  ;;  %v1584_v22 = vld [vmem:[#allocation21 + $0x10] sm:$0xff]   ;;  %v1585_v23 = vld [vmem:[#allocation21 + $0x18] sm:$0xff]  }
 0x1d4   :  { %1456 = vmatprep.subr.bf16.mxu0 %v1868_v0  ;;  %1476 = vmatprep.subr.bf16.mxu1 %v1868_v0 }
 0x1d7   :  { %1457 = vmatpush3.bf16.msra.mxu0 %v876_v28  ;;  %1477 = vmatpush3.bf16.msra.mxu1 %v1576_v29 }
 0x1d8   :  { %1458 = vmatprep.subr.bf16.mxu0 %v1868_v0  ;;  %1478 = vmatprep.subr.bf16.mxu1 %v1868_v0 }
 0x1db   :  { %1459 = vmatpush3.bf16.msra.mxu0 %v877_v35  ;;  %1479 = vmatpush3.bf16.msra.mxu1 %v1577_v36 }
 0x1dc   :  { %1460 = vmatprep.subr.bf16.mxu0 %v1868_v0  ;;  %1480 = vmatprep.subr.bf16.mxu1 %v1868_v0 }
 0x1df   :  { %1461 = vmatpush3.bf16.msra.mxu0 %v878_v43  ;;  %1481 = vmatpush3.bf16.msra.mxu1 %v1578_v44 }
 0x1e0   :  { %1462 = vmatprep.subr.bf16.mxu0 %v1868_v0  ;;  %1482 = vmatprep.subr.bf16.mxu1 %v1868_v0 }
 0x1e3   :  { %1463 = vmatpush3.bf16.msra.mxu0 %v879_v50  ;;  %1483 = vmatpush3.bf16.msra.mxu1 %v1579_v51 }
 0x1e4   :  { %1464 = vmatprep.subr.bf16.mxu0 %v1868_v0  ;;  %1484 = vmatprep.subr.bf16.mxu1 %v1868_v0 }
 0x1e7   :  { %1465 = vmatpush3.bf16.msra.mxu0 %v880_v56  ;;  %1485 = vmatpush3.bf16.msra.mxu1 %v1580_v57 }
 0x1e8   :  { %1466 = vmatprep.subr.bf16.mxu0 %v1868_v0  ;;  %1486 = vmatprep.subr.bf16.mxu1 %v1868_v0 }
 0x1eb   :  { %1467 = vmatpush3.bf16.msra.mxu0 %v881_v62  ;;  %1487 = vmatpush3.bf16.msra.mxu1 %v1581_v63 }
 0x1ec   :  { %1492 = vmatprep.subr.bf16.mxu0 %v1868_v0 }
 0x2a0   :  { %v660_v1 = vpop.f32.mrb[4].mxu0  ;;  %v807_v3 = vpop.f32.mrb[4].mxu1 }
 0x2a1   :  { %v1223_v2 = vmul.f32 -1.442695, %v660_v1  ;;  %v1410_v4 = vpop.f32.mrb[5].mxu0  ;;  %v1450_v5 = vpop.f32.mrb[5].mxu1 }
 0x2a2   :  { %v663_v6 = vpop.f32.mrb[6].mxu0  ;;  %v810_v8 = vpop.f32.mrb[6].mxu1 }
 0x2a3   :  { %1590 = vpow2.f32 %v1223_v2  ;;  %v1224_v7 = vmul.f32 -1.442695, %v663_v6  ;;  %v1411_v9 = vpop.f32.mrb[7].mxu0  ;;  %v1451_v10 = vpop.f32.mrb[7].mxu1 }
 0x2a5   :  { %1592 = vpow2.f32 %v1224_v7 }
 0x2ad   :  { %v1591_v38 = vpop.eup %1590 }
 0x2ae   :  { %v820_v41 = vadd.f32 1.0, %v1591_v38 }
 0x2af   :  { %v1593_v11 = vpop.eup %1592 }
 0x2b0   :  { %1594 = vrcp.f32 %v820_v41  ;;  %v821_v12 = vadd.f32 1.0, %v1593_v11 }
 0x2b2   :  { %1596 = vrcp.f32 %v821_v12 }
 0x2ba   :  { %v1595_v13 = vpop.eup %1594 }
 0x2bb   :  { %v826_v14 = vmul.f32 %v1595_v13, %v660_v1 }
 0x2bc   :  { %v1597_v15 = vpop.eup %1596 }
 0x2bd   :  { %v828_v17 = vmul.f32 %v826_v14, %v807_v3  ;;  %v827_v16 = vmul.f32 %v1597_v15, %v663_v6 }
 0x2bf   :  { %v829_v18 = vmul.f32 %v827_v16, %v810_v8 }
 0x2c1   :  { %v830_v20 = vpack.c.bf16 %v829_v18, %v828_v17 }
 0x2c3   :  { %1469 = vmatmul.mubr.bf16.vlgmr.msra.gmra.mrb[8].mxu0 %v830_v20  ;;  %1489 = vmatmul.mubr.bf16.vlgmr.msra.gmra.mrb[8].mxu1 %v830_v20 }
 0x2c4   :  { %1493 = vmatpush3.bf16.msra.mxu0 %v1582_v19  ;;  %1508 = vmatprep.mubr.msk.bf16.mxu0 %vm1869_vm0, %v1868_v0 }
 0x2c5   :  { %1494 = vmatprep.subr.bf16.mxu0 %v1868_v0 }
 0x2c8   :  { %1495 = vmatpush3.bf16.msra.mxu0 %v1583_v21 }
 0x2c9   :  { %1496 = vmatprep.subr.bf16.mxu0 %v1868_v0 }
 0x2cc   :  { %1497 = vmatpush3.bf16.msra.mxu0 %v1584_v22 }
 0x2cd   :  { %1498 = vmatprep.subr.bf16.mxu0 %v1868_v0 }
 0x2d0   :  { %1499 = vmatpush3.bf16.msra.mxu0 %v1585_v23 }
 0x2d1   :  { %1500 = vmatprep.subr.bf16.mxu0 %v1868_v0 }
 0x2d4   :  { %1501 = vmatpush3.bf16.msra.mxu0 %v1586_v24 }
 0x2d5   :  { %1502 = vmatprep.subr.bf16.mxu0 %v1868_v0 }
 0x2d8   :  { %1503 = vmatpush3.bf16.msra.mxu0 %v1587_v25 }
 0x2d9   :  { %1504 = vmatprep.subr.bf16.mxu0 %v1868_v0 }
 0x2dc   :  { %1505 = vmatpush3.bf16.msra.mxu0 %v1588_v26 }
 0x2dd   :  { %1506 = vmatprep.subr.bf16.mxu0 %v1868_v0 }
 0x2e0   :  { %1507 = vmatpush3.bf16.msra.mxu0 %v1589_v27 }
 0x396   :  { %v1029_v28 = vpop.f32.mrb[8].mxu1 }
 0x397   :  { %v1490_v29 = vpop.f32.mrb[9].mxu1 }
 0x398   :  { %v1032_v30 = vpop.f32.mrb[10].mxu1 }
 0x399   :  { %v1047_v31 = vpack.c.bf16 %v1032_v30, %v1029_v28  ;;  %v1491_v32 = vpop.f32.mrb[11].mxu1 }
 0x39b   :  { %1509 = vmatmul.mubr.bf16.vlgmr.msra.gmra.mrb[8].mxu0 %v1047_v31 }
 0x46e   :  { %v1146_v33 = vpop.f32.mrb[8].mxu0 }
 0x46f   :  { %v1510_v34 = vpop.f32.mrb[9].mxu0 }
 0x470   :  { %v1149_v35 = vpop.f32.mrb[10].mxu0 }
 0x471   :  { %v1249_v36 = vpack.c.bf16 %v1149_v35, %v1146_v33  ;;  %v1511_v37 = vpop.f32.mrb[11].mxu0 }
 0x473   :  { %1250 = vst [vmem:[#allocation23] sm:$0xff] %v1249_v36  }
 0x474   :  { %1829 = shalt.err (!%p1826_p0)
}
 0x475   :  { %s1830_s29 = scalar_lea.hbm %s2306_s13, 128 }
 0x476   :  { %p1831_p1 = scmp.ne.s32.totalorder %s2306_s13, %s1830_s29  ;;  %p1834_p2 = scmp.lt.u32.totalorder %s1830_s29, %s2306_s13 }
 0x478   :  { %p1836_p3 = pnand %p1834_p2, %p1831_p1 }
 0x47a   :  { %1839 = shalt.err (!%p1836_p3)
}
 0x47b   :  { %1176 = dma.vmem_to_hbm [thread:$0]  %s1171_s27, 128, %s2306_s13, [#allocation8], %s1860_s23, %s1860_s23, %s1861_s14  }
 0x47c   :  { %1852 = dma.done.wait [#allocation8], 128  }
 0x47d   :  { %1853 = vsyncadd [#allocation8], 4294967168 }
 0x47e   :  { %1180 = vsyncpa [#allocation7], 1 }
 0x47f   :  { %1181 = vsyncpa [#allocation10], 1 }
 0x480   :  { %1182 = vsyncpa [#allocation13], 1 }
 0x481   :  { %1183 = vsyncpa [#allocation16], 1 }
 0x482   :  { %1184 = vsyncpa [#allocation19], 1 }
 0x483   :  { %1185 = vsyncpa [#allocation22], 1 }
 0x484   :  { %1186 = vsyncpa [#allocation8], 1 }

</bundles_post_ra>
